<compile_context>
chip_gen: v6e
topology: v6e:2x2x1
jax: 0.10.0
libtpu: 0.0.40
codegen_flags: <defaults>
</compile_context>

<pallas_src>
import functools

import jax
import jax.numpy as jnp
from jax.experimental import pallas as pl
from jax.experimental.pallas import tpu as pltpu

EPS = 1e-5                       # PyTorch LayerNorm default
MATMUL_DTYPE = jnp.bfloat16      # MXU operand dtype (accumulation stays f32)

# Row layout of the packed scalar-vector parameter array.
_ROW_LN1_G, _ROW_LN1_B, _ROW_LN2_G, _ROW_LN2_B, _ROW_BATT, _ROW_B2, _ROW_B1 = range(7)


def block_kernel(
    x_ref,                         # (B*T, C)       f32
    vec_ref,                       # (8, max(C,F))  f32  packed LN/bias vectors
    wqkv_ref,                      # (C, 3C)        bf16 fused [Wq | Wk | Wv], x @ W form
    watt_ref,                      # (H*D, C)       bf16 att_linear.T (x @ W form)
    w1_ref,                        # (C, F)         bf16
    w2_ref,                        # (F, C)         bf16
    out_ref,                       # (B*T, C)       f32
    *, batch, seq, num_heads, head_size, ff_size,
):
    B, T, H, D, F = batch, seq, num_heads, head_size, ff_size
    BT, C = x_ref.shape
    DT = wqkv_ref.dtype            # matmul operand dtype

    x = x_ref[...]                 # (BT, C) f32
    vecs = vec_ref[...]
    ln1_g, ln1_b = vecs[_ROW_LN1_G:_ROW_LN1_G + 1, :C], vecs[_ROW_LN1_B:_ROW_LN1_B + 1, :C]
    ln2_g, ln2_b = vecs[_ROW_LN2_G:_ROW_LN2_G + 1, :C], vecs[_ROW_LN2_B:_ROW_LN2_B + 1, :C]
    batt = vecs[_ROW_BATT:_ROW_BATT + 1, :C]
    b2 = vecs[_ROW_B2:_ROW_B2 + 1, :C]
    b1 = vecs[_ROW_B1:_ROW_B1 + 1, :F]

    # ---- shared LayerNorm statistics (both LNs normalize the same x) ----
    mu = jnp.mean(x, axis=-1, keepdims=True)
    xc = x - mu
    var = jnp.mean(xc * xc, axis=-1, keepdims=True)
    xn = xc * jax.lax.rsqrt(var + EPS)                        # (BT, C) f32
    ln1 = (xn * ln1_g + ln1_b).astype(DT)
    ln2 = (xn * ln2_g + ln2_b).astype(DT)

    # ---- attention branch: fused QKV projection (one MXU push for all rows) ----
    qkv = jnp.dot(ln1, wqkv_ref[...],
                  preferred_element_type=jnp.float32).astype(DT)   # (BT, 3C)

    scale = head_size ** (-0.5)

    # Per-(batch, head) QK^T (NT dot_general, no explicit transpose); stack all
    # affinity blocks along sublanes so the softmax is ONE max/exp/sum/recip.
    aff_blocks = []
    for b in range(B):             # static unroll, B*H is small
        r = b * T
        for h in range(H):
            c = h * D
            q = qkv[r:r + T, c:c + D]                  # (T, D)
            k = qkv[r:r + T, C + c:C + c + D]          # (T, D)
            aff_blocks.append(jax.lax.dot_general(
                q, k, (((1,), (1,)), ((), ())),
                preferred_element_type=jnp.float32))   # (T, T) f32
    aff = jnp.concatenate(aff_blocks, axis=0) * scale  # (B*H*T, T)
    aff = aff - jnp.max(aff, axis=-1, keepdims=True)
    p = jnp.exp(aff)
    p = (p * pl.reciprocal(jnp.sum(p, axis=-1, keepdims=True),
                           approx=True)).astype(DT)    # (B*H*T, T)

    # Per-(batch, head) PV dot; heads concatenated along lanes so the output
    # projection is a single (BT, H*D) x (H*D, C) matmul.
    rows = []
    for b in range(B):
        r = b * T
        head_outs = []
        for h in range(H):
            c = 2 * C + h * D
            v = qkv[r:r + T, c:c + D]                              # (T, D)
            pb = p[(b * H + h) * T:(b * H + h + 1) * T, :]         # (T, T)
            head_outs.append(jnp.dot(pb, v,
                                     preferred_element_type=jnp.float32))
        rows.append(jnp.concatenate(head_outs, axis=-1))           # (T, H*D)
    heads_cat = jnp.concatenate(rows, axis=0).astype(DT)           # (BT, H*D)

    att = jnp.dot(heads_cat, watt_ref[...],
                  preferred_element_type=jnp.float32) + batt       # (BT, C)

    # ---- feed-forward branch: Linear -> ReLU -> Linear ----
    h1 = jnp.dot(ln2, w1_ref[...],
                 preferred_element_type=jnp.float32) + b1          # (BT, F)
    h1 = jnp.maximum(h1, 0.0).astype(DT)
    ff = jnp.dot(h1, w2_ref[...],
                 preferred_element_type=jnp.float32) + b2          # (BT, C)

    out_ref[...] = (x + ff + att).astype(out_ref.dtype)


def prepare_block_params(params):
    """One-time weight prep (hoisted out of the per-call path)."""
    H, D, C = params["wq"].shape
    F = params["w1"].shape[0]
    P = max(C, F)
    f32 = jnp.float32

    # PyTorch per-head (out=D, in=C) weights -> x @ W layout, head-blocked columns.
    to_xw = lambda w: jnp.transpose(w, (2, 0, 1)).reshape(C, H * D)
    wqkv = jnp.concatenate(
        [to_xw(params["wq"]), to_xw(params["wk"]), to_xw(params["wv"])],
        axis=-1).astype(MATMUL_DTYPE)                           # (C, 3C)

    # Pack all tiny scalar-vector params into one (8, P) array (one DMA).
    pad = lambda v: jnp.pad(v.astype(f32), (0, P - v.shape[0]))
    vecs = jnp.stack([
        pad(params["ln1_g"]), pad(params["ln1_b"]),
        pad(params["ln2_g"]), pad(params["ln2_b"]),
        pad(params["batt"]), pad(params["b2"]),
        pad(params["b1"]), jnp.zeros((P,), f32),
    ])                                                          # (8, P)

    return dict(
        num_heads=H,
        vecs=vecs,
        wqkv=wqkv,
        watt=params["watt"].T.astype(MATMUL_DTYPE),             # (H*D, C)
        w1=params["w1"].T.astype(MATMUL_DTYPE),                 # (C, F)
        w2=params["w2"].T.astype(MATMUL_DTYPE),                 # (F, C)
    )


def transformer_block(x, prep):
    B, T, C = x.shape
    H = prep["num_heads"]
    HD = prep["watt"].shape[0]
    D = HD // H
    F = prep["w1"].shape[1]
    P = prep["vecs"].shape[1]
    BT = B * T

    x2 = x.reshape(BT, C)          # fold batch into rows: one kernel step total
    kernel = functools.partial(block_kernel, batch=B, seq=T,
                               num_heads=H, head_size=D, ff_size=F)

    full = lambda shape: pl.BlockSpec(shape, lambda i: (0,) * len(shape))

    out = pl.pallas_call(
        kernel,
        out_shape=jax.ShapeDtypeStruct((BT, C), jnp.float32),
        grid_spec=pltpu.PrefetchScalarGridSpec(
            num_scalar_prefetch=0,
            grid=(1,),
            in_specs=[
                full((BT, C)),                                  # x (batch folded)
                full((8, P)),                                   # packed LN/bias vectors
                full((C, 3 * C)),                               # fused Wqkv
                full((HD, C)),                                  # att proj W (2D)
                full((C, F)),                                   # ff W1
                full((F, C)),                                   # ff W2
            ],
            out_specs=full((BT, C)),
        ),
        compiler_params=pltpu.CompilerParams(
            dimension_semantics=("arbitrary",),
            vmem_limit_bytes=32 * 1024 * 1024,
        ),
    )(x2, prep["vecs"], prep["wqkv"], prep["watt"], prep["w1"], prep["w2"])
    return out.reshape(B, T, C)


def reference_forward(x, params, *, num_heads):
    """Pure-JAX f32 reference mirroring the (intended) PyTorch forward."""
    B, T, C = x.shape
    D = C // num_heads

    def ln(y, g, b):
        mu = jnp.mean(y, axis=-1, keepdims=True)
        var = jnp.mean((y - mu) ** 2, axis=-1, keepdims=True)
        return (y - mu) * jax.lax.rsqrt(var + EPS) * g + b

    ln1 = ln(x, params["ln1_g"], params["ln1_b"])
    heads = []
    for h in range(num_heads):
        q = ln1 @ params["wq"][h].T
        k = ln1 @ params["wk"][h].T
        v = ln1 @ params["wv"][h].T
        aff = (q @ jnp.swapaxes(k, 1, 2)) * D ** (-0.5)
        aff = jax.nn.softmax(aff, axis=2)
        heads.append(aff @ v)
    att = jnp.concatenate(heads, axis=-1)
    att = att @ params["watt"].T + params["batt"]
    ln2 = ln(x, params["ln2_g"], params["ln2_b"])
    ff = jax.nn.relu(ln2 @ params["w1"].T + params["b1"]) @ params["w2"].T + params["b2"]
    return x + ff + att


if __name__ == "__main__":
    B, T, C = 2, 8, 32          # batch, seq, emb_size
    H = 4                       # num_heads
    D = C // H                  # head_size
    F = 64                      # ff_size

    key = jax.random.PRNGKey(0)
    keys = jax.random.split(key, 10)
    init = lambda k, shape: (0.02 * jax.random.normal(k, shape)).astype(jnp.float32)

    params = {
        "ln1_g": jnp.ones((C,), jnp.float32), "ln1_b": jnp.zeros((C,), jnp.float32),
        "ln2_g": jnp.ones((C,), jnp.float32), "ln2_b": jnp.zeros((C,), jnp.float32),
        # per-head Linear weights in PyTorch (out, in) layout, stacked over heads
        "wq": init(keys[0], (H, D, C)),
        "wk": init(keys[1], (H, D, C)),
        "wv": init(keys[2], (H, D, C)),
        "watt": init(keys[3], (C, C)), "batt": init(keys[4], (C,)),
        "w1": init(keys[5], (F, C)), "b1": init(keys[6], (F,)),
        "w2": init(keys[7], (C, F)), "b2": init(keys[8], (C,)),
    }

    x = jax.random.normal(keys[9], (B, T, C), jnp.float32)

    prep = prepare_block_params(params)          # hoisted one-time weight prep
    out = transformer_block(x, prep)
    out = jax.block_until_ready(out)

    ref = reference_forward(x, params, num_heads=H)
    assert out.shape == (B, T, C)
    # bf16 MXU operands + approx reciprocal loosen agreement slightly vs the f32 reference.
    assert jnp.allclose(out, ref, atol=2e-3, rtol=2e-3), "mismatch vs JAX reference"

    print("KERNEL_OK")
</pallas_src>

<mosaic_0001>
module attributes {stable_mosaic.version = 11 : i64} {
  func.func @block_kernel(%arg0: i32, %arg1: memref<16x32xf32, #tpu.memory_space<vmem>>, %arg2: memref<8x64xf32, #tpu.memory_space<vmem>>, %arg3: memref<32x96xbf16, #tpu.memory_space<vmem>>, %arg4: memref<32x32xbf16, #tpu.memory_space<vmem>>, %arg5: memref<32x64xbf16, #tpu.memory_space<vmem>>, %arg6: memref<64x32xbf16, #tpu.memory_space<vmem>>, %arg7: memref<16x32xf32, #tpu.memory_space<vmem>>) attributes {dimension_semantics = [#tpu.dimension_semantics<arbitrary>], iteration_bounds = array<i64: 1>, scalar_prefetch = 0 : i64, scratch_operands = 0 : i64, tpu.core_type = #tpu.core_type<tc>, window_params = [{pipeline_mode = #tpu.pipeline_mode<synchronous>, transform_indices = @transform_0, window_bounds = array<i64: 16, 32>}, {pipeline_mode = #tpu.pipeline_mode<synchronous>, transform_indices = @transform_1, window_bounds = array<i64: 8, 64>}, {pipeline_mode = #tpu.pipeline_mode<synchronous>, transform_indices = @transform_2, window_bounds = array<i64: 32, 96>}, {pipeline_mode = #tpu.pipeline_mode<synchronous>, transform_indices = @transform_3, window_bounds = array<i64: 32, 32>}, {pipeline_mode = #tpu.pipeline_mode<synchronous>, transform_indices = @transform_4, window_bounds = array<i64: 32, 64>}, {pipeline_mode = #tpu.pipeline_mode<synchronous>, transform_indices = @transform_5, window_bounds = array<i64: 64, 32>}, {pipeline_mode = #tpu.pipeline_mode<synchronous>, transform_indices = @transform_6, window_bounds = array<i64: 16, 32>}]} {
    %c0 = arith.constant 0 : index
    %c0_0 = arith.constant 0 : index
    %0 = vector.load %arg1[%c0, %c0_0] : memref<16x32xf32, #tpu.memory_space<vmem>>, vector<16x32xf32>
    %c0_1 = arith.constant 0 : index
    %c0_2 = arith.constant 0 : index
    %1 = vector.load %arg2[%c0_1, %c0_2] : memref<8x64xf32, #tpu.memory_space<vmem>>, vector<8x64xf32>
    %2 = vector.extract_strided_slice %1 {offsets = [0, 0], sizes = [1, 32], strides = [1, 1]} : vector<8x64xf32> to vector<1x32xf32>
    %3 = vector.extract_strided_slice %1 {offsets = [1, 0], sizes = [1, 32], strides = [1, 1]} : vector<8x64xf32> to vector<1x32xf32>
    %4 = vector.extract_strided_slice %1 {offsets = [2, 0], sizes = [1, 32], strides = [1, 1]} : vector<8x64xf32> to vector<1x32xf32>
    %5 = vector.extract_strided_slice %1 {offsets = [3, 0], sizes = [1, 32], strides = [1, 1]} : vector<8x64xf32> to vector<1x32xf32>
    %6 = vector.extract_strided_slice %1 {offsets = [4, 0], sizes = [1, 32], strides = [1, 1]} : vector<8x64xf32> to vector<1x32xf32>
    %7 = vector.extract_strided_slice %1 {offsets = [5, 0], sizes = [1, 32], strides = [1, 1]} : vector<8x64xf32> to vector<1x32xf32>
    %8 = vector.extract_strided_slice %1 {offsets = [6, 0], sizes = [1, 64], strides = [1, 1]} : vector<8x64xf32> to vector<1x64xf32>
    %cst = arith.constant dense<0.000000e+00> : vector<16xf32>
    %9 = vector.multi_reduction <add>, %0, %cst [1] : vector<16x32xf32> to vector<16xf32>
    %10 = vector.shape_cast %9 : vector<16xf32> to vector<16x1xf32>
    %cst_3 = arith.constant 3.200000e+01 : f32
    %11 = vector.broadcast %cst_3 : f32 to vector<16x1xf32>
    %12 = arith.divf %10, %11 : vector<16x1xf32>
    %13 = vector.broadcast %12 : vector<16x1xf32> to vector<16x32xf32>
    %14 = arith.subf %0, %13 : vector<16x32xf32>
    %15 = arith.mulf %14, %14 : vector<16x32xf32>
    %cst_4 = arith.constant dense<0.000000e+00> : vector<16xf32>
    %16 = vector.multi_reduction <add>, %15, %cst_4 [1] : vector<16x32xf32> to vector<16xf32>
    %17 = vector.shape_cast %16 : vector<16xf32> to vector<16x1xf32>
    %cst_5 = arith.constant 3.200000e+01 : f32
    %18 = vector.broadcast %cst_5 : f32 to vector<16x1xf32>
    %19 = arith.divf %17, %18 : vector<16x1xf32>
    %cst_6 = arith.constant 9.99999974E-6 : f32
    %20 = vector.broadcast %cst_6 : f32 to vector<16x1xf32>
    %21 = arith.addf %19, %20 : vector<16x1xf32>
    %22 = math.rsqrt %21 : vector<16x1xf32>
    %23 = vector.broadcast %22 : vector<16x1xf32> to vector<16x32xf32>
    %24 = arith.mulf %14, %23 : vector<16x32xf32>
    %25 = vector.broadcast %2 : vector<1x32xf32> to vector<16x32xf32>
    %26 = arith.mulf %24, %25 : vector<16x32xf32>
    %27 = vector.broadcast %3 : vector<1x32xf32> to vector<16x32xf32>
    %28 = arith.addf %26, %27 : vector<16x32xf32>
    %29 = arith.truncf %28 : vector<16x32xf32> to vector<16x32xbf16>
    %30 = vector.broadcast %4 : vector<1x32xf32> to vector<16x32xf32>
    %31 = arith.mulf %24, %30 : vector<16x32xf32>
    %32 = vector.broadcast %5 : vector<1x32xf32> to vector<16x32xf32>
    %33 = arith.addf %31, %32 : vector<16x32xf32>
    %34 = arith.truncf %33 : vector<16x32xf32> to vector<16x32xbf16>
    %c0_7 = arith.constant 0 : index
    %c0_8 = arith.constant 0 : index
    %35 = vector.load %arg3[%c0_7, %c0_8] : memref<32x96xbf16, #tpu.memory_space<vmem>>, vector<32x96xbf16>
    %cst_9 = arith.constant dense<0.000000e+00> : vector<16x96xf32>
    %36 = tpu.matmul %29, %35, %cst_9 {dimension_numbers = #tpu.dot_dimension_numbers<[1], [0], [0], [1], [0, 0, 1, 1], [], []>} : vector<16x32xbf16>, vector<32x96xbf16>, vector<16x96xf32> -> vector<16x96xf32>
    %37 = arith.truncf %36 : vector<16x96xf32> to vector<16x96xbf16>
    %38 = vector.extract_strided_slice %37 {offsets = [0, 0], sizes = [8, 8], strides = [1, 1]} : vector<16x96xbf16> to vector<8x8xbf16>
    %39 = vector.extract_strided_slice %37 {offsets = [0, 32], sizes = [8, 8], strides = [1, 1]} : vector<16x96xbf16> to vector<8x8xbf16>
    %cst_10 = arith.constant dense<0.000000e+00> : vector<8x8xf32>
    %40 = tpu.matmul %38, %39, %cst_10 {dimension_numbers = #tpu.dot_dimension_numbers<[1], [1], [0], [0], [0, 0, 1, 0], [], []>} : vector<8x8xbf16>, vector<8x8xbf16>, vector<8x8xf32> -> vector<8x8xf32>
    %41 = vector.extract_strided_slice %37 {offsets = [0, 8], sizes = [8, 8], strides = [1, 1]} : vector<16x96xbf16> to vector<8x8xbf16>
    %42 = vector.extract_strided_slice %37 {offsets = [0, 40], sizes = [8, 8], strides = [1, 1]} : vector<16x96xbf16> to vector<8x8xbf16>
    %cst_11 = arith.constant dense<0.000000e+00> : vector<8x8xf32>
    %43 = tpu.matmul %41, %42, %cst_11 {dimension_numbers = #tpu.dot_dimension_numbers<[1], [1], [0], [0], [0, 0, 1, 0], [], []>} : vector<8x8xbf16>, vector<8x8xbf16>, vector<8x8xf32> -> vector<8x8xf32>
    %44 = vector.extract_strided_slice %37 {offsets = [0, 16], sizes = [8, 8], strides = [1, 1]} : vector<16x96xbf16> to vector<8x8xbf16>
    %45 = vector.extract_strided_slice %37 {offsets = [0, 48], sizes = [8, 8], strides = [1, 1]} : vector<16x96xbf16> to vector<8x8xbf16>
    %cst_12 = arith.constant dense<0.000000e+00> : vector<8x8xf32>
    %46 = tpu.matmul %44, %45, %cst_12 {dimension_numbers = #tpu.dot_dimension_numbers<[1], [1], [0], [0], [0, 0, 1, 0], [], []>} : vector<8x8xbf16>, vector<8x8xbf16>, vector<8x8xf32> -> vector<8x8xf32>
    %47 = vector.extract_strided_slice %37 {offsets = [0, 24], sizes = [8, 8], strides = [1, 1]} : vector<16x96xbf16> to vector<8x8xbf16>
    %48 = vector.extract_strided_slice %37 {offsets = [0, 56], sizes = [8, 8], strides = [1, 1]} : vector<16x96xbf16> to vector<8x8xbf16>
    %cst_13 = arith.constant dense<0.000000e+00> : vector<8x8xf32>
    %49 = tpu.matmul %47, %48, %cst_13 {dimension_numbers = #tpu.dot_dimension_numbers<[1], [1], [0], [0], [0, 0, 1, 0], [], []>} : vector<8x8xbf16>, vector<8x8xbf16>, vector<8x8xf32> -> vector<8x8xf32>
    %50 = vector.extract_strided_slice %37 {offsets = [8, 0], sizes = [8, 8], strides = [1, 1]} : vector<16x96xbf16> to vector<8x8xbf16>
    %51 = vector.extract_strided_slice %37 {offsets = [8, 32], sizes = [8, 8], strides = [1, 1]} : vector<16x96xbf16> to vector<8x8xbf16>
    %cst_14 = arith.constant dense<0.000000e+00> : vector<8x8xf32>
    %52 = tpu.matmul %50, %51, %cst_14 {dimension_numbers = #tpu.dot_dimension_numbers<[1], [1], [0], [0], [0, 0, 1, 0], [], []>} : vector<8x8xbf16>, vector<8x8xbf16>, vector<8x8xf32> -> vector<8x8xf32>
    %53 = vector.extract_strided_slice %37 {offsets = [8, 8], sizes = [8, 8], strides = [1, 1]} : vector<16x96xbf16> to vector<8x8xbf16>
    %54 = vector.extract_strided_slice %37 {offsets = [8, 40], sizes = [8, 8], strides = [1, 1]} : vector<16x96xbf16> to vector<8x8xbf16>
    %cst_15 = arith.constant dense<0.000000e+00> : vector<8x8xf32>
    %55 = tpu.matmul %53, %54, %cst_15 {dimension_numbers = #tpu.dot_dimension_numbers<[1], [1], [0], [0], [0, 0, 1, 0], [], []>} : vector<8x8xbf16>, vector<8x8xbf16>, vector<8x8xf32> -> vector<8x8xf32>
    %56 = vector.extract_strided_slice %37 {offsets = [8, 16], sizes = [8, 8], strides = [1, 1]} : vector<16x96xbf16> to vector<8x8xbf16>
    %57 = vector.extract_strided_slice %37 {offsets = [8, 48], sizes = [8, 8], strides = [1, 1]} : vector<16x96xbf16> to vector<8x8xbf16>
    %cst_16 = arith.constant dense<0.000000e+00> : vector<8x8xf32>
    %58 = tpu.matmul %56, %57, %cst_16 {dimension_numbers = #tpu.dot_dimension_numbers<[1], [1], [0], [0], [0, 0, 1, 0], [], []>} : vector<8x8xbf16>, vector<8x8xbf16>, vector<8x8xf32> -> vector<8x8xf32>
    %59 = vector.extract_strided_slice %37 {offsets = [8, 24], sizes = [8, 8], strides = [1, 1]} : vector<16x96xbf16> to vector<8x8xbf16>
    %60 = vector.extract_strided_slice %37 {offsets = [8, 56], sizes = [8, 8], strides = [1, 1]} : vector<16x96xbf16> to vector<8x8xbf16>
    %cst_17 = arith.constant dense<0.000000e+00> : vector<8x8xf32>
    %61 = tpu.matmul %59, %60, %cst_17 {dimension_numbers = #tpu.dot_dimension_numbers<[1], [1], [0], [0], [0, 0, 1, 0], [], []>} : vector<8x8xbf16>, vector<8x8xbf16>, vector<8x8xf32> -> vector<8x8xf32>
    %62 = tpu.concatenate %40, %43, %46, %49, %52, %55, %58, %61 in 0 : vector<8x8xf32>, vector<8x8xf32>, vector<8x8xf32>, vector<8x8xf32>, vector<8x8xf32>, vector<8x8xf32>, vector<8x8xf32>, vector<8x8xf32> -> vector<64x8xf32>
    %cst_18 = arith.constant 0.353553385 : f32
    %63 = vector.broadcast %cst_18 : f32 to vector<64x8xf32>
    %64 = arith.mulf %62, %63 : vector<64x8xf32>
    %cst_19 = arith.constant dense<0xFF800000> : vector<64xf32>
    %65 = vector.multi_reduction <maximumf>, %64, %cst_19 [1] : vector<64x8xf32> to vector<64xf32>
    %66 = vector.shape_cast %65 : vector<64xf32> to vector<64x1xf32>
    %67 = vector.broadcast %66 : vector<64x1xf32> to vector<64x8xf32>
    %68 = arith.subf %64, %67 : vector<64x8xf32>
    %69 = math.exp %68 : vector<64x8xf32>
    %cst_20 = arith.constant dense<0.000000e+00> : vector<64xf32>
    %70 = vector.multi_reduction <add>, %69, %cst_20 [1] : vector<64x8xf32> to vector<64xf32>
    %71 = vector.shape_cast %70 : vector<64xf32> to vector<64x1xf32>
    %72 = tpu.reciprocal %71 {approx = true} : vector<64x1xf32> -> vector<64x1xf32>
    %73 = vector.broadcast %72 : vector<64x1xf32> to vector<64x8xf32>
    %74 = arith.mulf %69, %73 : vector<64x8xf32>
    %75 = arith.truncf %74 : vector<64x8xf32> to vector<64x8xbf16>
    %76 = vector.extract_strided_slice %37 {offsets = [0, 64], sizes = [8, 8], strides = [1, 1]} : vector<16x96xbf16> to vector<8x8xbf16>
    %77 = vector.extract_strided_slice %75 {offsets = [0, 0], sizes = [8, 8], strides = [1, 1]} : vector<64x8xbf16> to vector<8x8xbf16>
    %cst_21 = arith.constant dense<0.000000e+00> : vector<8x8xf32>
    %78 = tpu.matmul %77, %76, %cst_21 {dimension_numbers = #tpu.dot_dimension_numbers<[1], [0], [0], [1], [0, 0, 1, 1], [], []>} : vector<8x8xbf16>, vector<8x8xbf16>, vector<8x8xf32> -> vector<8x8xf32>
    %79 = vector.extract_strided_slice %37 {offsets = [0, 72], sizes = [8, 8], strides = [1, 1]} : vector<16x96xbf16> to vector<8x8xbf16>
    %80 = vector.extract_strided_slice %75 {offsets = [8, 0], sizes = [8, 8], strides = [1, 1]} : vector<64x8xbf16> to vector<8x8xbf16>
    %cst_22 = arith.constant dense<0.000000e+00> : vector<8x8xf32>
    %81 = tpu.matmul %80, %79, %cst_22 {dimension_numbers = #tpu.dot_dimension_numbers<[1], [0], [0], [1], [0, 0, 1, 1], [], []>} : vector<8x8xbf16>, vector<8x8xbf16>, vector<8x8xf32> -> vector<8x8xf32>
    %82 = vector.extract_strided_slice %37 {offsets = [0, 80], sizes = [8, 8], strides = [1, 1]} : vector<16x96xbf16> to vector<8x8xbf16>
    %83 = vector.extract_strided_slice %75 {offsets = [16, 0], sizes = [8, 8], strides = [1, 1]} : vector<64x8xbf16> to vector<8x8xbf16>
    %cst_23 = arith.constant dense<0.000000e+00> : vector<8x8xf32>
    %84 = tpu.matmul %83, %82, %cst_23 {dimension_numbers = #tpu.dot_dimension_numbers<[1], [0], [0], [1], [0, 0, 1, 1], [], []>} : vector<8x8xbf16>, vector<8x8xbf16>, vector<8x8xf32> -> vector<8x8xf32>
    %85 = vector.extract_strided_slice %37 {offsets = [0, 88], sizes = [8, 8], strides = [1, 1]} : vector<16x96xbf16> to vector<8x8xbf16>
    %86 = vector.extract_strided_slice %75 {offsets = [24, 0], sizes = [8, 8], strides = [1, 1]} : vector<64x8xbf16> to vector<8x8xbf16>
    %cst_24 = arith.constant dense<0.000000e+00> : vector<8x8xf32>
    %87 = tpu.matmul %86, %85, %cst_24 {dimension_numbers = #tpu.dot_dimension_numbers<[1], [0], [0], [1], [0, 0, 1, 1], [], []>} : vector<8x8xbf16>, vector<8x8xbf16>, vector<8x8xf32> -> vector<8x8xf32>
    %88 = tpu.concatenate %78, %81, %84, %87 in 1 : vector<8x8xf32>, vector<8x8xf32>, vector<8x8xf32>, vector<8x8xf32> -> vector<8x32xf32>
    %89 = vector.extract_strided_slice %37 {offsets = [8, 64], sizes = [8, 8], strides = [1, 1]} : vector<16x96xbf16> to vector<8x8xbf16>
    %90 = vector.extract_strided_slice %75 {offsets = [32, 0], sizes = [8, 8], strides = [1, 1]} : vector<64x8xbf16> to vector<8x8xbf16>
    %cst_25 = arith.constant dense<0.000000e+00> : vector<8x8xf32>
    %91 = tpu.matmul %90, %89, %cst_25 {dimension_numbers = #tpu.dot_dimension_numbers<[1], [0], [0], [1], [0, 0, 1, 1], [], []>} : vector<8x8xbf16>, vector<8x8xbf16>, vector<8x8xf32> -> vector<8x8xf32>
    %92 = vector.extract_strided_slice %37 {offsets = [8, 72], sizes = [8, 8], strides = [1, 1]} : vector<16x96xbf16> to vector<8x8xbf16>
    %93 = vector.extract_strided_slice %75 {offsets = [40, 0], sizes = [8, 8], strides = [1, 1]} : vector<64x8xbf16> to vector<8x8xbf16>
    %cst_26 = arith.constant dense<0.000000e+00> : vector<8x8xf32>
    %94 = tpu.matmul %93, %92, %cst_26 {dimension_numbers = #tpu.dot_dimension_numbers<[1], [0], [0], [1], [0, 0, 1, 1], [], []>} : vector<8x8xbf16>, vector<8x8xbf16>, vector<8x8xf32> -> vector<8x8xf32>
    %95 = vector.extract_strided_slice %37 {offsets = [8, 80], sizes = [8, 8], strides = [1, 1]} : vector<16x96xbf16> to vector<8x8xbf16>
    %96 = vector.extract_strided_slice %75 {offsets = [48, 0], sizes = [8, 8], strides = [1, 1]} : vector<64x8xbf16> to vector<8x8xbf16>
    %cst_27 = arith.constant dense<0.000000e+00> : vector<8x8xf32>
    %97 = tpu.matmul %96, %95, %cst_27 {dimension_numbers = #tpu.dot_dimension_numbers<[1], [0], [0], [1], [0, 0, 1, 1], [], []>} : vector<8x8xbf16>, vector<8x8xbf16>, vector<8x8xf32> -> vector<8x8xf32>
    %98 = vector.extract_strided_slice %37 {offsets = [8, 88], sizes = [8, 8], strides = [1, 1]} : vector<16x96xbf16> to vector<8x8xbf16>
    %99 = vector.extract_strided_slice %75 {offsets = [56, 0], sizes = [8, 8], strides = [1, 1]} : vector<64x8xbf16> to vector<8x8xbf16>
    %cst_28 = arith.constant dense<0.000000e+00> : vector<8x8xf32>
    %100 = tpu.matmul %99, %98, %cst_28 {dimension_numbers = #tpu.dot_dimension_numbers<[1], [0], [0], [1], [0, 0, 1, 1], [], []>} : vector<8x8xbf16>, vector<8x8xbf16>, vector<8x8xf32> -> vector<8x8xf32>
    %101 = tpu.concatenate %91, %94, %97, %100 in 1 : vector<8x8xf32>, vector<8x8xf32>, vector<8x8xf32>, vector<8x8xf32> -> vector<8x32xf32>
    %102 = tpu.concatenate %88, %101 in 0 : vector<8x32xf32>, vector<8x32xf32> -> vector<16x32xf32>
    %103 = arith.truncf %102 : vector<16x32xf32> to vector<16x32xbf16>
    %c0_29 = arith.constant 0 : index
    %c0_30 = arith.constant 0 : index
    %104 = vector.load %arg4[%c0_29, %c0_30] : memref<32x32xbf16, #tpu.memory_space<vmem>>, vector<32x32xbf16>
    %cst_31 = arith.constant dense<0.000000e+00> : vector<16x32xf32>
    %105 = tpu.matmul %103, %104, %cst_31 {dimension_numbers = #tpu.dot_dimension_numbers<[1], [0], [0], [1], [0, 0, 1, 1], [], []>} : vector<16x32xbf16>, vector<32x32xbf16>, vector<16x32xf32> -> vector<16x32xf32>
    %106 = vector.broadcast %6 : vector<1x32xf32> to vector<16x32xf32>
    %107 = arith.addf %105, %106 : vector<16x32xf32>
    %c0_32 = arith.constant 0 : index
    %c0_33 = arith.constant 0 : index
    %108 = vector.load %arg5[%c0_32, %c0_33] : memref<32x64xbf16, #tpu.memory_space<vmem>>, vector<32x64xbf16>
    %cst_34 = arith.constant dense<0.000000e+00> : vector<16x64xf32>
    %109 = tpu.matmul %34, %108, %cst_34 {dimension_numbers = #tpu.dot_dimension_numbers<[1], [0], [0], [1], [0, 0, 1, 1], [], []>} : vector<16x32xbf16>, vector<32x64xbf16>, vector<16x64xf32> -> vector<16x64xf32>
    %110 = vector.broadcast %8 : vector<1x64xf32> to vector<16x64xf32>
    %111 = arith.addf %109, %110 : vector<16x64xf32>
    %cst_35 = arith.constant 0.000000e+00 : f32
    %112 = vector.broadcast %cst_35 : f32 to vector<16x64xf32>
    %113 = arith.maximumf %111, %112 : vector<16x64xf32>
    %114 = arith.truncf %113 : vector<16x64xf32> to vector<16x64xbf16>
    %c0_36 = arith.constant 0 : index
    %c0_37 = arith.constant 0 : index
    %115 = vector.load %arg6[%c0_36, %c0_37] : memref<64x32xbf16, #tpu.memory_space<vmem>>, vector<64x32xbf16>
    %cst_38 = arith.constant dense<0.000000e+00> : vector<16x32xf32>
    %116 = tpu.matmul %114, %115, %cst_38 {dimension_numbers = #tpu.dot_dimension_numbers<[1], [0], [0], [1], [0, 0, 1, 1], [], []>} : vector<16x64xbf16>, vector<64x32xbf16>, vector<16x32xf32> -> vector<16x32xf32>
    %117 = vector.broadcast %7 : vector<1x32xf32> to vector<16x32xf32>
    %118 = arith.addf %116, %117 : vector<16x32xf32>
    %119 = arith.addf %0, %118 : vector<16x32xf32>
    %120 = arith.addf %119, %107 : vector<16x32xf32>
    %c0_39 = arith.constant 0 : index
    %c0_40 = arith.constant 0 : index
    %121 = vector.load %arg7[%c0_39, %c0_40] : memref<16x32xf32, #tpu.memory_space<vmem>>, vector<16x32xf32>
    tpu.vector_store %arg7[%c0_39, %c0_40], %120 {strides = array<i32>} : memref<16x32xf32, #tpu.memory_space<vmem>>, vector<16x32xf32>,
    return
  }
  func.func @transform_0(%arg0: i32) -> (i32, i32) {
    %c0_i32 = arith.constant 0 : i32
    %c0_i32_0 = arith.constant 0 : i32
    %c0_i32_1 = arith.constant 0 : i32
    return %c0_i32, %c0_i32_0 : i32, i32
  }
  func.func @transform_1(%arg0: i32) -> (i32, i32) {
    %c0_i32 = arith.constant 0 : i32
    %c0_i32_0 = arith.constant 0 : i32
    %c0_i32_1 = arith.constant 0 : i32
    return %c0_i32, %c0_i32_0 : i32, i32
  }
  func.func @transform_2(%arg0: i32) -> (i32, i32) {
    %c0_i32 = arith.constant 0 : i32
    %c0_i32_0 = arith.constant 0 : i32
    %c0_i32_1 = arith.constant 0 : i32
    return %c0_i32, %c0_i32_0 : i32, i32
  }
  func.func @transform_3(%arg0: i32) -> (i32, i32) {
    %c0_i32 = arith.constant 0 : i32
    %c0_i32_0 = arith.constant 0 : i32
    %c0_i32_1 = arith.constant 0 : i32
    return %c0_i32, %c0_i32_0 : i32, i32
  }
  func.func @transform_4(%arg0: i32) -> (i32, i32) {
    %c0_i32 = arith.constant 0 : i32
    %c0_i32_0 = arith.constant 0 : i32
    %c0_i32_1 = arith.constant 0 : i32
    return %c0_i32, %c0_i32_0 : i32, i32
  }
  func.func @transform_5(%arg0: i32) -> (i32, i32) {
    %c0_i32 = arith.constant 0 : i32
    %c0_i32_0 = arith.constant 0 : i32
    %c0_i32_1 = arith.constant 0 : i32
    return %c0_i32, %c0_i32_0 : i32, i32
  }
  func.func @transform_6(%arg0: i32) -> (i32, i32) {
    %c0_i32 = arith.constant 0 : i32
    %c0_i32_0 = arith.constant 0 : i32
    %c0_i32_1 = arith.constant 0 : i32
    return %c0_i32, %c0_i32_0 : i32, i32
  }
}

</mosaic_0001>

<bundles_post_ra>
// kernel: tpu_custom_call.1
= control target key start
LH: loop header
LB: loop body
LE: loop exit
PB: predicated region body
PF: predicated region fallthrough
CT: control target
= control target key end

     0   :  { %11 = vsyncpa [#allocation3], 0  ;;  %s2035_s0 = inlined_call_operand.vmem [shape: f32[16,32], index: 0, kind: input, shape index: {}]   ;;  %s2036_s1 = inlined_call_operand.hbm [shape: f32[8,64], index: 1, kind: input, shape index: {}]   ;;  %s2037_s2 = inlined_call_operand.vmem [shape: bf16[32,96], index: 2, kind: input, shape index: {}]   ;;  %s2038_s3 = inlined_call_operand.vmem [shape: bf16[32,32], index: 3, kind: input, shape index: {}]   ;;  %s2039_s4 = inlined_call_operand.hbm [shape: bf16[32,64], index: 4, kind: input, shape index: {}]   ;;  %s2040_s5 = inlined_call_operand.vmem [shape: bf16[64,32], index: 5, kind: input, shape index: {}]   ;;  %s2041_s6 = inlined_call_operand.hbm [shape: f32[16,32], index: 6, kind: output, shape index: {}]  }
   0x1   :  { %12 = vsyncpa [#allocation6], 0 }
   0x2   :  { %13 = vsyncpa [#allocation4], 0  ;;  %s1686_s21 = smov [#allocation2]   ;;  %s1687_s23 = smov [#allocation5]  }
   0x3   :  { %s22_s22 = sshll.u32 %s1686_s21, 4  ;;  %s35_s24 = sshll.u32 %s1687_s23, 4  ;;  %s23_s22 = int_to_ptr.vmem [resolvable:$true] %s22_s22  ;;  %s36_s24 = int_to_ptr.vmem [resolvable:$true] %s35_s24 }
   0x4   :  { %s1628_s25 = scalar_lea.vmem %s23_s22, 128  ;;  %p1633_p1 = scmp.lt.s32.totalorder %s23_s22, %s23_s22 }
   0x5   :  { %p1629_p0 = scmp.ne.s32.totalorder %s23_s22, %s1628_s25  ;;  %p1634_p2 = scmp.lt.s32.totalorder %s1628_s25, %s1628_s25 }
   0x7   :  { %p1635_p3 = por %p1634_p2, %p1633_p1 }
   0x9   :  { %p1636_p4 = pnand %p1635_p3, %p1629_p0 }
   0xb   :  { %1639 = shalt.err (!%p1636_p4)
}
   0xc   :  { %25 = dma.hbm_to_vmem [thread:$0]  %s2036_s1, 128, %s23_s22, [#allocation3]  }
   0xd   :  { %s1648_s28 = scalar_lea.vmem %s36_s24, 256  ;;  %p1653_p6 = scmp.lt.s32.totalorder %s36_s24, %s36_s24 }
   0xe   :  { %p1649_p5 = scmp.ne.s32.totalorder %s36_s24, %s1648_s28  ;;  %p1654_p7 = scmp.lt.s32.totalorder %s1648_s28, %s1648_s28 }
  0x10   :  { %p1655_p8 = por %p1654_p7, %p1653_p6 }
  0x12   :  { %p1656_p9 = pnand %p1655_p8, %p1649_p5 }
  0x14   :  { %1659 = shalt.err (!%p1656_p9)
}
  0x15   :  { %s1688_s29 = smov 64   ;;  %s1689_s30 = smov 4  }
  0x16   :  { %41 = dma.hbm_to_vmem [thread:$0]  %s2039_s4, 256, %s36_s24, [#allocation6], %s1688_s29, %s1688_s29, %s1689_s30  }
  0x17   :  { %1680 = dma.done.wait [#allocation3], 128  }
  0x18   :  { %1681 = vsyncadd [#allocation3], 4294967168 }
  0x19   :  { %1682 = dma.done.wait [#allocation6], 256  }
  0x1a   :  { %1683 = vsyncadd [#allocation6], 4294967040  ;;  %vm54_vm0 = vcmask 261120   ;;  %v1753_v0 = vld [vmem:[%s2035_s0] sm:$0xff]  ;;  %v1758_v1 = vld [vmem:[%s2035_s0 + $0x8] sm:$0xff]  ;;  %v1690_v15 = vmov 0.0   ;;  %v82_v23 = vlaneseq }
  0x1b   :  { %v55_v2 = vsel %vm54_vm0, %v1753_v0, 0.0  ;;  %v58_v3 = vsel %vm54_vm0, %v1758_v1, 0.0  ;;  %v1574_v14 = vld [vmem:[%s2037_s2 + $0x8] sm:$0xff]   ;;  %1406 = vmatprep.subr.bf16.mxu0 %v1690_v15  ;;  %vm1691_vm1 = vmmov 0   ;;  %v1575_v16 = vld [vmem:[%s2037_s2] sm:$0xff]   ;;  %1414 = vmatprep.subr.bf16.mxu1 %v1690_v15  ;;  %s1692_s2 = smov 88  }
  0x1c   :  { %56 = vadd.xlane.f32.xlu0 %v55_v2  ;;  %1410 = vmatprep.mubr.msk.bf16.mxu0 %vm1691_vm1, %v1690_v15  ;;  %v1782_v24 = vshrl.u32 %v82_v23, 7  ;;  %v1786_v27 = vld [vmem:[#allocation2] sm:$0xff]  ;;  %s1693_s14 = smov 96   ;;  %s1694_s15 = smov 120   ;;  %vm172_vm2 = vcmask 64512   ;;  %vm673_vm3 = vcmask 1043456  }
  0x1d   :  { %1407 = vmatpush3.bf16.msra.mxu0 %v1574_v14  ;;  %1416 = vmatprep.mubr.msk.bf16.mxu1 %vm1691_vm1, %v1690_v15  ;;  %s1695_s16 = smov 72   ;;  %s1696_s17 = smov 80   ;;  %vm878_vm4 = vcmask 130048   ;;  %vm880_vm5 = vcmask 195584   ;;  %vm1261_vm6 = vcmask 523264  }
  0x1e   :  { %1408 = vmatprep.subr.bf16.mxu0 %v1690_v15  ;;  %v84_v25 = vsub.s32 0, %v1782_v24  ;;  %v97_v26 = vsub.s32 2, %v1782_v24  ;;  %v90_v29 = vsub.s32 1, %v1782_v24  ;;  %v103_v33 = vsub.s32 3, %v1782_v24  ;;  %s1697_s18 = smov 104   ;;  %s1698_s19 = smov 112  }
  0x1f   :  { %s1699_s20 = smov 56   ;;  %s1700_s21 = smov 48  }
  0x20   :  { %59 = vadd.xlane.f32.xlu0 %v58_v3  ;;  %v85_v31 = vrot.slane %v1786_v27, %v84_v25  ;;  %v98_v32 = vrot.slane %v1786_v27, %v97_v26  ;;  %v91_v35 = vrot.slane %v1786_v27, %v90_v29  ;;  %v104_v39 = vrot.slane %v1786_v27, %v103_v33  ;;  %s1701_s22 = smov 40   ;;  %s1702_s27 = smov 8  }
  0x21   :  { %1409 = vmatpush3.bf16.msra.mxu0 %v1575_v16  ;;  %s1703_s28 = smov 16  }
  0x22   :  { %1420 = vmatprep.subr.bf16.mxu0 %v1690_v15 }
  0xa5   :  { %v57_v4 = vpop.xlane.xlu0 %56 }
  0xa6   :  { %v62_v5 = vmul.f32 0.03125, %v57_v4 }
  0xa8   :  { %v64_v6 = vsub.f32 %v1753_v0, %v62_v5 }
  0xa9   :  { %v60_v7 = vpop.xlane.xlu0 %59 }
  0xaa   :  { %v63_v8 = vmul.f32 0.03125, %v60_v7  ;;  %v66_v9 = vmul.f32 %v64_v6, %v64_v6 }
  0xac   :  { %v65_v10 = vsub.f32 %v1758_v1, %v63_v8  ;;  %v68_v11 = vsel %vm54_vm0, %v66_v9, 0.0 }
  0xad   :  { %69 = vadd.xlane.f32.xlu1 %v68_v11 }
  0xae   :  { %v67_v12 = vmul.f32 %v65_v10, %v65_v10 }
  0xb0   :  { %v71_v13 = vsel %vm54_vm0, %v67_v12, 0.0 }
  0xb1   :  { %72 = vadd.xlane.f32.xlu1 %v71_v13 }
 0x136   :  { %v70_v17 = vpop.xlane.xlu1 %69 }
 0x137   :  { %v74_v18 = vmul.f32 0.03125, %v70_v17 }
 0x139   :  { %v76_v19 = vadd.f32 1e-05, %v74_v18 }
 0x13a   :  { %v73_v20 = vpop.xlane.xlu1 %72 }
 0x13b   :  { %1584 = vrsqrt.f32 %v76_v19  ;;  %v75_v21 = vmul.f32 0.03125, %v73_v20 }
 0x13d   :  { %v77_v22 = vadd.f32 1e-05, %v75_v21 }
 0x13f   :  { %1586 = vrsqrt.f32 %v77_v22 }
 0x148   :  { %v1585_v28 = vpop.eup %1584 }
 0x149   :  { %v80_v30 = vmul.f32 %v1585_v28, %v64_v6 }
 0x14b   :  { %v86_v37 = vmul.f32 %v85_v31, %v80_v30  ;;  %v99_v38 = vmul.f32 %v98_v32, %v80_v30 }
 0x14c   :  { %v1587_v34 = vpop.eup %1586 }
 0x14d   :  { %v81_v36 = vmul.f32 %v1587_v34, %v65_v10  ;;  %v92_v42 = vadd.f32 %v91_v35, %v86_v37  ;;  %v1794_v44 = vadd.f32 %v104_v39, %v99_v38 }
 0x14f   :  { %v87_v40 = vmul.f32 %v85_v31, %v81_v36  ;;  %v100_v41 = vmul.f32 %v98_v32, %v81_v36 }
 0x151   :  { %v93_v43 = vadd.f32 %v91_v35, %v87_v40  ;;  %v1796_v45 = vadd.f32 %v104_v39, %v100_v41 }
 0x153   :  { %v94_v46 = vpack.c.bf16 %v93_v43, %v92_v42  ;;  %v107_v47 = vpack.c.bf16 %v1796_v45, %v1794_v44 }
 0x155   :  { %1411 = vmatmul.mubr.msk.bf16.vlgmr.msra.gmra.mxu0 %vm54_vm0, %v94_v46 }
 0x156   :  { %1422 = vmatprep.mubr.msk.bf16.mxu0 %vm1691_vm1, %v1690_v15 }
 0x215   :  { %v161_v48 = vpop.f32.mrf.mxu0 }
 0x217   :  { %v1412_v49 = vpop.f32.mrf.mxu0 }
 0x219   :  { %v164_v50 = vpop.f32.mrf.mxu0 }
 0x21a   :  { %v1803_v51 = vpack.c.bf16 %v164_v50, %v161_v48 }
 0x21b   :  { %v1413_v52 = vpop.f32.mrf.mxu0 }
 0x21c   :  { %221 = vrot.lane.b32.xlu1 %v1803_v51, %s1692_s2  ;;  %170 = vrot.lane.b32.xlu0 %v1803_v51, %s1693_s14  ;;  %v1812_v53 = vrot.slane %v1803_v51, 4 }
 0x220   :  { %219 = vrot.lane.b32.xlu1 %v1803_v51, %s1694_s15  ;;  %321 = vrot.lane.b32.xlu0 %v1803_v51, %s1695_s16 }
 0x224   :  { %271 = vrot.lane.b32.xlu1 %v1803_v51, %s1696_s17  ;;  %319 = vrot.lane.b32.xlu0 %v1803_v51, %s1697_s18 }
 0x228   :  { %269 = vrot.lane.b32.xlu1 %v1803_v51, %s1698_s19  ;;  %420 = vrot.lane.b32.xlu0 %v1812_v53, %s1692_s2 }
 0x22c   :  { %470 = vrot.lane.b32.xlu0 %v1812_v53, %s1696_s17  ;;  %370 = vrot.lane.b32.xlu1 %v1812_v53, %s1693_s14 }
 0x230   :  { %468 = vrot.lane.b32.xlu0 %v1812_v53, %s1698_s19  ;;  %418 = vrot.lane.b32.xlu1 %v1812_v53, %s1694_s15 }
 0x234   :  { %520 = vrot.lane.b32.xlu1 %v1812_v53, %s1695_s16 }
 0x238   :  { %518 = vrot.lane.b32.xlu1 %v1812_v53, %s1697_s18 }
 0x28e   :  { %v222_v54 = vpop.permute.xlu1 %221  ;;  %v171_v55 = vpop.permute.xlu0 %170 }
 0x28f   :  { %v227_v56 = vsel %vm172_vm2, %v222_v54, 0  ;;  %v177_v57 = vsel %vm172_vm2, %v171_v55, 0 }
 0x290   :  { %1415 = vmatpush3.bf16.xpose.msra.mxu1 %v177_v57  ;;  %1421 = vmatpush3.bf16.xpose.msra.mxu0 %v227_v56 }
 0x291   :  { %1426 = vmatprep.subr.bf16.mxu1 %v1690_v15  ;;  %1432 = vmatprep.subr.bf16.mxu0 %v1690_v15 }
 0x292   :  { %v220_v58 = vpop.permute.xlu1 %219  ;;  %v322_v59 = vpop.permute.xlu0 %321 }
 0x293   :  { %v327_v62 = vsel %vm172_vm2, %v322_v59, 0 }
 0x296   :  { %v272_v60 = vpop.permute.xlu1 %271  ;;  %v320_v61 = vpop.permute.xlu0 %319 }
 0x297   :  { %v277_v63 = vsel %vm172_vm2, %v272_v60, 0  ;;  %1417 = vmatmul.mubr.msk.bf16.vlgmr.msra.gmra.mxu1 %vm172_vm2, %v1803_v51  ;;  %1423 = vmatmul.mubr.msk.bf16.vlgmr.msra.gmra.mxu0 %vm172_vm2, %v220_v58 }
 0x298   :  { %1427 = vmatpush3.bf16.xpose.msra.mxu1 %v277_v63  ;;  %1433 = vmatpush3.bf16.xpose.msra.mxu0 %v327_v62 }
 0x299   :  { %1428 = vmatprep.mubr.msk.bf16.mxu1 %vm1691_vm1, %v1690_v15  ;;  %1434 = vmatprep.mubr.msk.bf16.mxu0 %vm1691_vm1, %v1690_v15 }
 0x29a   :  { %v270_v2 = vpop.permute.xlu1 %269  ;;  %1438 = vmatprep.subr.bf16.mxu1 %v1690_v15  ;;  %1444 = vmatprep.subr.bf16.mxu0 %v1690_v15  ;;  %v421_v3 = vpop.permute.xlu0 %420 }
 0x29b   :  { %v426_v5 = vsel %vm172_vm2, %v421_v3, 0 }
 0x29e   :  { %v371_v4 = vpop.permute.xlu1 %370  ;;  %v471_v8 = vpop.permute.xlu0 %470 }
 0x29f   :  { %v376_v6 = vsel %vm172_vm2, %v371_v4, 0  ;;  %1429 = vmatmul.mubr.msk.bf16.vlgmr.msra.gmra.mxu1 %vm172_vm2, %v270_v2  ;;  %1435 = vmatmul.mubr.msk.bf16.vlgmr.msra.gmra.mxu0 %vm172_vm2, %v320_v61  ;;  %v476_v10 = vsel %vm172_vm2, %v471_v8, 0 }
 0x2a0   :  { %1439 = vmatpush3.bf16.xpose.msra.mxu1 %v376_v6  ;;  %1445 = vmatpush3.bf16.xpose.msra.mxu0 %v426_v5 }
 0x2a1   :  { %1440 = vmatprep.mubr.msk.bf16.mxu1 %vm1691_vm1, %v1690_v15  ;;  %1446 = vmatprep.mubr.msk.bf16.mxu0 %vm1691_vm1, %v1690_v15 }
 0x2a2   :  { %v419_v7 = vpop.permute.xlu1 %418  ;;  %1450 = vmatprep.subr.bf16.mxu1 %v1690_v15  ;;  %1456 = vmatprep.subr.bf16.mxu0 %v1690_v15  ;;  %v469_v12 = vpop.permute.xlu0 %468 }
 0x2a6   :  { %v521_v9 = vpop.permute.xlu1 %520 }
 0x2a7   :  { %v526_v11 = vsel %vm172_vm2, %v521_v9, 0  ;;  %1441 = vmatmul.mubr.msk.bf16.vlgmr.msra.gmra.mxu1 %vm172_vm2, %v1812_v53  ;;  %1447 = vmatmul.mubr.msk.bf16.vlgmr.msra.gmra.mxu0 %vm172_vm2, %v419_v7 }
 0x2a8   :  { %1451 = vmatpush3.bf16.xpose.msra.mxu1 %v476_v10  ;;  %1457 = vmatpush3.bf16.xpose.msra.mxu0 %v526_v11 }
 0x2a9   :  { %1452 = vmatprep.mubr.msk.bf16.mxu1 %vm1691_vm1, %v1690_v15  ;;  %1458 = vmatprep.mubr.msk.bf16.mxu0 %vm1691_vm1, %v1690_v15 }
 0x2aa   :  { %1468 = vmatprep.subr.bf16.mxu0 %v1690_v15  ;;  %1462 = vmatprep.subr.bf16.mxu1 %v1690_v15  ;;  %v519_v13 = vpop.permute.xlu1 %518 }
 0x2af   :  { %1453 = vmatmul.mubr.msk.bf16.vlgmr.msra.gmra.mxu1 %vm172_vm2, %v469_v12  ;;  %1459 = vmatmul.mubr.msk.bf16.vlgmr.msra.gmra.mxu0 %vm172_vm2, %v519_v13 }
 0x2b0   :  { %1464 = vmatprep.mubr.msk.bf16.mxu1 %vm1691_vm1, %v1690_v15  ;;  %1470 = vmatprep.mubr.msk.bf16.mxu0 %vm1691_vm1, %v1690_v15 }
 0x357   :  { %v213_v14 = vpop.f32.mrf.mxu1  ;;  %v263_v16 = vpop.f32.mrf.mxu0 }
 0x358   :  { %v1864_v17 = vmul.f32 0.35355338, %v213_v14  ;;  %v1866_v18 = vmul.f32 0.35355338, %v263_v16 }
 0x359   :  { %v1418_v19 = vpop.f32.mrf.mxu1  ;;  %v1424_v20 = vpop.f32.mrf.mxu0 }
 0x35a   :  { %v576_v21 = vsel %vm172_vm2, %v1864_v17, -inf  ;;  %v579_v22 = vsel %vm172_vm2, %v1866_v18, -inf }
 0x35b   :  { %v216_v23 = vpop.f32.mrf.mxu1  ;;  %577 = vmax.xlane.f32.xlu0 %v576_v21  ;;  %580 = vmax.xlane.f32.xlu1 %v579_v22  ;;  %v266_v25 = vpop.f32.mrf.mxu0 }
 0x35d   :  { %v1419_v26 = vpop.f32.mrf.mxu1  ;;  %v1425_v28 = vpop.f32.mrf.mxu0 }
 0x35f   :  { %v313_v29 = vpop.f32.mrf.mxu1  ;;  %v363_v30 = vpop.f32.mrf.mxu0 }
 0x360   :  { %v570_v31 = vmul.f32 0.35355338, %v313_v29  ;;  %v1872_v34 = vmul.f32 0.35355338, %v363_v30 }
 0x361   :  { %v1430_v32 = vpop.f32.mrf.mxu1  ;;  %v1436_v33 = vpop.f32.mrf.mxu0 }
 0x362   :  { %v582_v35 = vsel %vm172_vm2, %v570_v31, -inf  ;;  %v585_v40 = vsel %vm172_vm2, %v1872_v34, -inf }
 0x363   :  { %v316_v36 = vpop.f32.mrf.mxu1  ;;  %583 = vmax.xlane.f32.xlu0 %v582_v35  ;;  %v366_v37 = vpop.f32.mrf.mxu0 }
 0x365   :  { %v1431_v38 = vpop.f32.mrf.mxu1  ;;  %v1437_v39 = vpop.f32.mrf.mxu0 }
 0x367   :  { %v412_v41 = vpop.f32.mrf.mxu1  ;;  %586 = vmax.xlane.f32.xlu0 %v585_v40  ;;  %v462_v42 = vpop.f32.mrf.mxu0 }
 0x368   :  { %v1877_v43 = vmul.f32 0.35355338, %v412_v41  ;;  %v1879_v46 = vmul.f32 0.35355338, %v462_v42 }
 0x369   :  { %v1442_v48 = vpop.f32.mrf.mxu1  ;;  %v1448_v49 = vpop.f32.mrf.mxu0 }
 0x36a   :  { %v588_v50 = vsel %vm172_vm2, %v1877_v43, -inf  ;;  %v591_v52 = vsel %vm172_vm2, %v1879_v46, -inf }
 0x36b   :  { %v415_v54 = vpop.f32.mrf.mxu1  ;;  %589 = vmax.xlane.f32.xlu0 %v588_v50  ;;  %592 = vmax.xlane.f32.xlu1 %v591_v52  ;;  %v465_v55 = vpop.f32.mrf.mxu0 }
 0x36d   :  { %v1443_v56 = vpop.f32.mrf.mxu1  ;;  %v1449_v57 = vpop.f32.mrf.mxu0 }
 0x36f   :  { %v512_v58 = vpop.f32.mrf.mxu1  ;;  %v562_v59 = vpop.f32.mrf.mxu0 }
 0x370   :  { %v1885_v60 = vmul.f32 0.35355338, %v512_v58  ;;  %v575_v6 = vmul.f32 0.35355338, %v562_v59 }
 0x371   :  { %v1454_v61 = vpop.f32.mrf.mxu1  ;;  %v1460_v62 = vpop.f32.mrf.mxu0 }
 0x372   :  { %v594_v63 = vsel %vm172_vm2, %v1885_v60, -inf  ;;  %v597_v7 = vsel %vm172_vm2, %v575_v6, -inf }
 0x373   :  { %v515_v2 = vpop.f32.mrf.mxu1  ;;  %595 = vmax.xlane.f32.xlu0 %v594_v63  ;;  %v565_v3 = vpop.f32.mrf.mxu0 }
 0x375   :  { %v1455_v4 = vpop.f32.mrf.mxu1  ;;  %v1461_v5 = vpop.f32.mrf.mxu0 }
 0x37c   :  { %719 = vrot.lane.b32.xlu1 %v1803_v51, %s1699_s20 }
 0x380   :  { %767 = vrot.lane.b32.xlu1 %v1803_v51, %s1700_s21 }
 0x389   :  { %668 = vrot.lane.b32.xlu0 %v1803_v51, %s1688_s29 }
 0x3a4   :  { %598 = vmax.xlane.f32.xlu1 %v597_v7 }
 0x3b5   :  { %817 = vrot.lane.b32.xlu1 %v1803_v51, %s1701_s22 }
 0x3e4   :  { %v578_v8 = vpop.xlane.xlu0 %577  ;;  %v581_v9 = vpop.xlane.xlu1 %580 }
 0x3e5   :  { %v600_v10 = vsub.f32 %v1864_v17, %v578_v8  ;;  %v601_v11 = vsub.f32 %v1866_v18, %v581_v9 }
 0x3e7   :  { %v608_v12 = vmul.f32 1.442695, %v600_v10  ;;  %v610_v13 = vmul.f32 1.442695, %v601_v11 }
 0x3e9   :  { %1588 = vpow2.f32 %v608_v12 }
 0x3ea   :  { %1590 = vpow2.f32 %v610_v13 }
 0x3ec   :  { %v584_v14 = vpop.xlane.xlu0 %583 }
 0x3ed   :  { %v602_v16 = vsub.f32 %v570_v31, %v584_v14 }
 0x3ef   :  { %v612_v19 = vmul.f32 1.442695, %v602_v16 }
 0x3f0   :  { %v587_v20 = vpop.xlane.xlu0 %586 }
 0x3f1   :  { %1592 = vpow2.f32 %v612_v19  ;;  %v603_v33 = vsub.f32 %v1872_v34, %v587_v20 }
 0x3f3   :  { %v614_v35 = vmul.f32 1.442695, %v603_v33 }
 0x3f4   :  { %v593_v21 = vpop.xlane.xlu1 %592  ;;  %v590_v17 = vpop.xlane.xlu0 %589 }
 0x3f5   :  { %v605_v36 = vsub.f32 %v1879_v46, %v593_v21  ;;  %v604_v37 = vsub.f32 %v1877_v43, %v590_v17  ;;  %1594 = vpow2.f32 %v614_v35 }
 0x3f6   :  { %v1900_v22 = vpop.eup %1588 }
 0x3f7   :  { %v1591_v51 = vpop.eup %1590  ;;  %v624_v23 = vsel %vm172_vm2, %v1900_v22, 0.0  ;;  %v618_v38 = vmul.f32 1.442695, %v605_v36  ;;  %v616_v39 = vmul.f32 1.442695, %v604_v37 }
 0x3f8   :  { %625 = vadd.xlane.f32.xlu0 %v624_v23  ;;  %v720_v18 = vpop.permute.xlu1 %719  ;;  %v627_v25 = vsel %vm172_vm2, %v1591_v51, 0.0 }
 0x3f9   :  { %v725_v26 = vsel %vm673_vm3, %v720_v18, 0  ;;  %628 = vadd.xlane.f32.xlu1 %v627_v25  ;;  %1596 = vpow2.f32 %v618_v38 }
 0x3fa   :  { %1469 = vmatpush3.bf16.msra.mxu0 %v725_v26  ;;  %1598 = vpow2.f32 %v616_v39 }
 0x3fb   :  { %1480 = vmatprep.subr.bf16.mxu0 %v1690_v15 }
 0x3fc   :  { %v596_v28 = vpop.xlane.xlu0 %595  ;;  %v768_v42 = vpop.permute.xlu1 %767 }
 0x3fd   :  { %v606_v40 = vsub.f32 %v1885_v60, %v596_v28 }
 0x3fe   :  { %v1907_v29 = vpop.eup %1592 }
 0x3ff   :  { %v630_v30 = vsel %vm172_vm2, %v1907_v29, 0.0  ;;  %v620_v41 = vmul.f32 1.442695, %v606_v40 }
 0x400   :  { %631 = vadd.xlane.f32.xlu0 %v630_v30  ;;  %v669_v31 = vpop.permute.xlu0 %668 }
 0x401   :  { %v675_v32 = vsel %vm673_vm3, %v669_v31, 0  ;;  %1600 = vpow2.f32 %v620_v41 }
 0x402   :  { %1463 = vmatpush3.bf16.msra.mxu1 %v675_v32  ;;  %v1595_v48 = vpop.eup %1594 }
 0x403   :  { %1474 = vmatprep.subr.bf16.mxu1 %v1690_v15  ;;  %v633_v34 = vsel %vm172_vm2, %v1595_v48, 0.0 }
 0x406   :  { %v1922_v50 = vpop.eup %1596 }
 0x407   :  { %v1924_v43 = vpop.eup %1598  ;;  %v639_v54 = vsel %vm172_vm2, %v1922_v50, 0.0 }
 0x408   :  { %v636_v55 = vsel %vm172_vm2, %v1924_v43, 0.0 }
 0x40a   :  { %932 = vrot.lane.b32.xlu1 %v1812_v53, %s1699_s20 }
 0x40e   :  { %v1930_v56 = vpop.eup %1600 }
 0x40f   :  { %v642_v57 = vsel %vm172_vm2, %v1930_v56, 0.0 }
 0x416   :  { %882 = vrot.lane.b32.xlu0 %v1812_v53, %s1688_s29  ;;  %s1704_s29 = smov 24  }
 0x42d   :  { %v599_v49 = vpop.xlane.xlu1 %598 }
 0x42e   :  { %634 = vadd.xlane.f32.xlu1 %v633_v34  ;;  %v607_v46 = vsub.f32 %v575_v6, %v599_v49  ;;  %v773_v6 = vsel %vm673_vm3, %v768_v42, 0  ;;  %v1576_v42 = vld [vmem:[#allocation5 + $0x8] sm:$0xff]   ;;  %v1577_v34 = vld [vmem:[#allocation5] sm:$0xff]  }
 0x430   :  { %v622_v52 = vmul.f32 1.442695, %v607_v46 }
 0x431   :  { %v818_v60 = vpop.permute.xlu1 %817 }
 0x432   :  { %1602 = vpow2.f32 %v622_v52  ;;  %640 = vadd.xlane.f32.xlu1 %v639_v54 }
 0x435   :  { %637 = vadd.xlane.f32.xlu0 %v636_v55 }
 0x439   :  { %643 = vadd.xlane.f32.xlu0 %v642_v57 }
 0x43f   :  { %v1934_v58 = vpop.eup %1602 }
 0x440   :  { %v645_v59 = vsel %vm172_vm2, %v1934_v58, 0.0 }
 0x441   :  { %646 = vadd.xlane.f32.xlu1 %v645_v59 }
 0x44f   :  { %980 = vrot.lane.b32.xlu0 %v1812_v53, %s1700_s21 }
 0x452   :  { %1030 = vrot.lane.b32.xlu1 %v1812_v53, %s1701_s22  ;;  %v823_v53 = vsel %vm673_vm3, %v818_v60, 0  ;;  %v1578_v60 = vld [vmem:[%s2038_s3 + $0x8] sm:$0xff]  }
 0x481   :  { %v626_v61 = vpop.xlane.xlu0 %625 }
 0x482   :  { %1604 = vrcp.f32 %v626_v61  ;;  %v629_v62 = vpop.xlane.xlu1 %628 }
 0x483   :  { %1606 = vrcp.f32 %v629_v62 }
 0x486   :  { %v933_v8 = vpop.permute.xlu1 %932 }
 0x487   :  { %v938_v26 = vsel %vm673_vm3, %v933_v8, 0 }
 0x489   :  { %v632_v9 = vpop.xlane.xlu0 %631 }
 0x48a   :  { %1608 = vrcp.f32 %v632_v9 }
 0x48d   :  { %v883_v11 = vpop.permute.xlu0 %882 }
 0x48e   :  { %v888_v23 = vsel %vm673_vm3, %v883_v11, 0 }
 0x48f   :  { %v1605_v63 = vpop.eup %1604 }
 0x490   :  { %v1607_v2 = vpop.eup %1606  ;;  %v656_v3 = vmul.f32 %v1605_v63, %v1900_v22 }
 0x491   :  { %v657_v4 = vmul.f32 %v1607_v2, %v1591_v51 }
 0x493   :  { %v664_v5 = vpack.c.bf16 %v657_v4, %v656_v3 }
 0x495   :  { %1465 = vmatmul.mubr.msk.bf16.vlgmr.msra.gmra.mxu1 %vm172_vm2, %v664_v5  ;;  %v718_v7 = vrot.slane %v664_v5, 4 }
 0x496   :  { %1475 = vmatpush3.bf16.msra.mxu1 %v773_v6  ;;  %1476 = vmatprep.mubr.msk.bf16.mxu1 %vm1691_vm1, %v1690_v15 }
 0x497   :  { %1471 = vmatmul.mubr.msk.bf16.vlgmr.msra.gmra.mxu0 %vm172_vm2, %v718_v7  ;;  %1486 = vmatprep.subr.bf16.mxu1 %v1690_v15  ;;  %v1609_v14 = vpop.eup %1608  ;;  %v1579_v7 = vld [vmem:[%s2038_s3] sm:$0xff]  }
 0x498   :  { %1481 = vmatpush3.bf16.msra.mxu0 %v823_v53  ;;  %1482 = vmatprep.mubr.msk.bf16.mxu0 %vm1691_vm1, %v1690_v15  ;;  %v658_v20 = vmul.f32 %v1609_v14, %v1907_v29 }
 0x499   :  { %1492 = vmatprep.subr.bf16.mxu0 %v1690_v15 }
 0x4b7   :  { %v635_v10 = vpop.xlane.xlu1 %634 }
 0x4b8   :  { %1610 = vrcp.f32 %v635_v10 }
 0x4bb   :  { %v641_v12 = vpop.xlane.xlu1 %640 }
 0x4bc   :  { %1612 = vrcp.f32 %v641_v12 }
 0x4be   :  { %v638_v13 = vpop.xlane.xlu0 %637 }
 0x4bf   :  { %1614 = vrcp.f32 %v638_v13 }
 0x4c2   :  { %v644_v19 = vpop.xlane.xlu0 %643 }
 0x4c3   :  { %1616 = vrcp.f32 %v644_v19 }
 0x4c5   :  { %v1611_v16 = vpop.eup %1610 }
 0x4c6   :  { %v659_v21 = vmul.f32 %v1611_v16, %v1595_v48  ;;  %v981_v30 = vpop.permute.xlu0 %980 }
 0x4c7   :  { %v986_v35 = vsel %vm673_vm3, %v981_v30, 0 }
 0x4c8   :  { %v665_v22 = vpack.c.bf16 %v659_v21, %v658_v20  ;;  %v1164_v20 = vsub.s32 6, %v1782_v24 }
 0x4c9   :  { %v1613_v51 = vpop.eup %1612 }
 0x4ca   :  { %1477 = vmatmul.mubr.msk.bf16.vlgmr.msra.gmra.mxu1 %vm172_vm2, %v665_v22  ;;  %v647_v17 = vpop.xlane.xlu1 %646  ;;  %v816_v18 = vrot.slane %v665_v22, 4  ;;  %v661_v29 = vmul.f32 %v1613_v51, %v1922_v50 }
 0x4cb   :  { %1487 = vmatpush3.bf16.msra.mxu1 %v888_v23  ;;  %1618 = vrcp.f32 %v647_v17  ;;  %1488 = vmatprep.mubr.msk.bf16.mxu1 %vm1691_vm1, %v1690_v15  ;;  %v1165_v23 = vrot.slane %v1786_v27, %v1164_v20 }
 0x4cc   :  { %v1615_v25 = vpop.eup %1614  ;;  %1483 = vmatmul.mubr.msk.bf16.vlgmr.msra.gmra.mxu0 %vm172_vm2, %v816_v18  ;;  %1498 = vmatprep.subr.bf16.mxu1 %v1690_v15 }
 0x4cd   :  { %1493 = vmatpush3.bf16.msra.mxu0 %v938_v26  ;;  %v660_v28 = vmul.f32 %v1615_v25, %v1924_v43  ;;  %1494 = vmatprep.mubr.msk.bf16.mxu0 %vm1691_vm1, %v1690_v15 }
 0x4ce   :  { %1504 = vmatprep.subr.bf16.mxu0 %v1690_v15  ;;  %v1031_v32 = vpop.permute.xlu1 %1030 }
 0x4cf   :  { %v666_v31 = vpack.c.bf16 %v661_v29, %v660_v28  ;;  %v1036_v36 = vsel %vm673_vm3, %v1031_v32, 0 }
 0x4d0   :  { %v1617_v37 = vpop.eup %1616 }
 0x4d1   :  { %v931_v33 = vrot.slane %v666_v31, 4  ;;  %v662_v39 = vmul.f32 %v1617_v37, %v1930_v56 }
 0x4d2   :  { %1489 = vmatmul.mubr.msk.bf16.vlgmr.msra.gmra.mxu1 %vm172_vm2, %v666_v31 }
 0x4d3   :  { %1499 = vmatpush3.bf16.msra.mxu1 %v986_v35  ;;  %1500 = vmatprep.mubr.msk.bf16.mxu1 %vm1691_vm1, %v1690_v15 }
 0x4d4   :  { %1495 = vmatmul.mubr.msk.bf16.vlgmr.msra.gmra.mxu0 %vm172_vm2, %v931_v33  ;;  %1510 = vmatprep.subr.bf16.mxu1 %v1690_v15 }
 0x4d5   :  { %1505 = vmatpush3.bf16.msra.mxu0 %v1036_v36  ;;  %1506 = vmatprep.mubr.msk.bf16.mxu0 %vm1691_vm1, %v1690_v15 }
 0x4d6   :  { %1518 = vmatprep.subr.bf16.mxu0 %v1690_v15 }
 0x4d8   :  { %v1619_v38 = vpop.eup %1618 }
 0x4d9   :  { %v663_v40 = vmul.f32 %v1619_v38, %v1934_v58 }
 0x4db   :  { %v667_v41 = vpack.c.bf16 %v663_v40, %v662_v39 }
 0x4dd   :  { %1501 = vmatmul.mubr.msk.bf16.vlgmr.msra.gmra.mxu1 %vm172_vm2, %v667_v41  ;;  %v1029_v48 = vrot.slane %v667_v41, 4 }
 0x4de   :  { %1514 = vmatprep.mubr.msk.bf16.mxu1 %vm1691_vm1, %v1690_v15  ;;  %1511 = vmatpush3.bf16.msra.mxu1 %v1578_v60 }
 0x4df   :  { %1507 = vmatmul.mubr.msk.bf16.vlgmr.msra.gmra.mxu0 %vm172_vm2, %v1029_v48  ;;  %1512 = vmatprep.subr.bf16.mxu1 %v1690_v15 }
 0x4e0   :  { %1519 = vmatpush3.bf16.msra.mxu0 %v1576_v42  ;;  %1522 = vmatprep.mubr.msk.bf16.mxu0 %vm1691_vm1, %v1690_v15 }
 0x4e1   :  { %1520 = vmatprep.subr.bf16.mxu0 %v1690_v15 }
 0x4e2   :  { %1513 = vmatpush3.bf16.msra.mxu1 %v1579_v7 }
 0x4e3   :  { %1526 = vmatprep.subr.bf16.mxu1 %v1690_v15 }
 0x4e4   :  { %1521 = vmatpush3.bf16.msra.mxu0 %v1577_v34 }
 0x4e7   :  { %1523 = vmatmul.mubr.msk.bf16.vlgmr.msra.gmra.mxu0 %vm54_vm0, %v107_v47 }
 0x555   :  { %v1989_v49 = vpop.f32.mrf.mxu1 }
 0x557   :  { %v1466_v50 = vpop.f32.mrf.mxu1  ;;  %v761_v46 = vpop.f32.mrf.mxu0 }
 0x559   :  { %v714_v52 = vpop.f32.mrf.mxu1  ;;  %v1472_v43 = vpop.f32.mrf.mxu0 }
 0x55b   :  { %v1467_v54 = vpop.f32.mrf.mxu1  ;;  %v764_v55 = vpop.f32.mrf.mxu0 }
 0x55c   :  { %v1580_v54 = vld [vmem:[%s2040_s5 + $0x18] sm:$0xff]  }
 0x55d   :  { %v1473_v56 = vpop.f32.mrf.mxu0 }
 0x55e   :  { %v1582_v56 = vld [vmem:[%s2040_s5 + $0x8] sm:$0xff]  }
 0x58a   :  { %v809_v57 = vpop.f32.mrf.mxu1 }
 0x58c   :  { %v1478_v58 = vpop.f32.mrf.mxu1  ;;  %v859_v59 = vpop.f32.mrf.mxu0 }
 0x58e   :  { %v812_v61 = vpop.f32.mrf.mxu1  ;;  %v1484_v44 = vpop.f32.mrf.mxu0 }
 0x58f   :  { %v1235_v44 = vsub.s32 5, %v1782_v24 }
 0x590   :  { %v1479_v45 = vpop.f32.mrf.mxu1  ;;  %v862_v47 = vpop.f32.mrf.mxu0 }
 0x591   :  { %v1100_v45 = vsub.s32 4, %v1782_v24  ;;  %v1236_v47 = vrot.slane %v1786_v27, %v1235_v44 }
 0x592   :  { %v1485_v62 = vpop.f32.mrf.mxu0  ;;  %v924_v63 = vpop.f32.mrf.mxu1 }
 0x593   :  { %v1101_v62 = vrot.slane %v1786_v27, %v1100_v45 }
 0x594   :  { %v1490_v2 = vpop.f32.mrf.mxu1  ;;  %v974_v3 = vpop.f32.mrf.mxu0 }
 0x595   :  { %v1559_v4 = vpack.i.bf16 %v974_v3, %v761_v46 }
 0x596   :  { %v927_v5 = vpop.f32.mrf.mxu1  ;;  %v1496_v6 = vpop.f32.mrf.mxu0 }
 0x597   :  { %1560 = vrot.lane.b32.xlu0 %v1559_v4, %s1702_s27 }
 0x598   :  { %v1491_v53 = vpop.f32.mrf.mxu1  ;;  %v977_v8 = vpop.f32.mrf.mxu0 }
 0x59a   :  { %v1497_v9 = vpop.f32.mrf.mxu0 }
 0x59d   :  { %v1022_v10 = vpop.f32.mrf.mxu1 }
 0x59e   :  { %v1564_v11 = vpack.i.bf16 %v1022_v10, %v809_v57  ;;  %v1583_v57 = vld [vmem:[%s2040_s5] sm:$0xff]  }
 0x59f   :  { %v1502_v12 = vpop.f32.mrf.mxu1  ;;  %v1072_v13 = vpop.f32.mrf.mxu0 }
 0x5a0   :  { %v1569_v14 = vpack.i.bf16 %v1072_v13, %v859_v59  ;;  %1565 = vrot.lane.b32.xlu1 %v1564_v11, %s1703_s28 }
 0x5a1   :  { %v1025_v16 = vpop.f32.mrf.mxu1  ;;  %v1508_v19 = vpop.f32.mrf.mxu0 }
 0x5a2   :  { %1570 = vrot.lane.b32.xlu0 %v1569_v14, %s1704_s29 }
 0x5a3   :  { %v1503_v21 = vpop.f32.mrf.mxu1  ;;  %v1075_v22 = vpop.f32.mrf.mxu0 }
 0x5a5   :  { %v1509_v51 = vpop.f32.mrf.mxu0 }
 0x5a7   :  { %v1215_v17 = vpop.f32.mrf.mxu0 }
 0x5a8   :  { %v1216_v25 = vadd.f32 %v1215_v17, %v1165_v23 }
 0x5a9   :  { %v1524_v18 = vpop.f32.mrf.mxu0 }
 0x5aa   :  { %v1222_v30 = vmax.f32 %v1216_v25, 0.0 }
 0x5ab   :  { %v1218_v26 = vpop.f32.mrf.mxu0 }
 0x5ac   :  { %v1219_v28 = vadd.f32 %v1218_v26, %v1165_v23 }
 0x5ad   :  { %v1525_v29 = vpop.f32.mrf.mxu0 }
 0x5ae   :  { %v1223_v31 = vmax.f32 %v1219_v28, 0.0 }
 0x5b0   :  { %v1224_v32 = vpack.c.bf16 %v1223_v31, %v1222_v30 }
 0x609   :  { %v1561_v33 = vpop.permute.xlu0 %1560 }
 0x60a   :  { %v1563_v35 = vunpack.i.h.bf16 %v1561_v33  ;;  %v1562_v36 = vunpack.i.l.bf16 %v1561_v33 }
 0x60c   :  { %v1090_v40 = vsel %vm172_vm2, %v924_v63, %v1563_v35  ;;  %v877_v41 = vsel %vm172_vm2, %v1989_v49, %v1562_v36  ;;  %v1581_v49 = vld [vmem:[%s2040_s5 + $0x10] sm:$0xff]   ;;  %s1705_s5 = smov [#allocation7]  }
 0x60d   :  { %s1317_s0 = sshll.u32 %s1705_s5, 4  ;;  %s1318_s0 = int_to_ptr.vmem [resolvable:$true] %s1317_s0 }
 0x60e   :  { %s1660_s4 = scalar_lea.vmem %s1318_s0, 256  ;;  %p1665_p11 = scmp.lt.s32.totalorder %s1318_s0, %s1318_s0 }
 0x60f   :  { %p1661_p10 = scmp.ne.s32.totalorder %s1318_s0, %s1660_s4  ;;  %p1666_p12 = scmp.lt.s32.totalorder %s1660_s4, %s1660_s4 }
 0x611   :  { %p1667_p13 = por %p1666_p12, %p1665_p11 }
 0x612   :  { %v1566_v37 = vpop.permute.xlu1 %1565 }
 0x613   :  { %v1568_v38 = vunpack.i.h.bf16 %v1566_v37  ;;  %v1567_v39 = vunpack.i.l.bf16 %v1566_v37  ;;  %p1668_p0 = pnand %p1667_p13, %p1661_p10 }
 0x614   :  { %v1571_v42 = vpop.permute.xlu0 %1570 }
 0x615   :  { %v879_v48 = vsel %vm878_vm4, %v877_v41, %v1567_v39  ;;  %v1091_v34 = vsel %vm878_vm4, %v1090_v40, %v1568_v38  ;;  %v1573_v50 = vunpack.i.h.bf16 %v1571_v42  ;;  %v1572_v46 = vunpack.i.l.bf16 %v1571_v42 }
 0x617   :  { %v1092_v52 = vsel %vm880_vm5, %v1091_v34, %v1573_v50  ;;  %v881_v43 = vsel %vm880_vm5, %v879_v48, %v1572_v46 }
 0x618   :  { %v1093_v55 = vpack.c.bf16 %v1092_v52, %v881_v43 }
 0x61a   :  { %1515 = vmatmul.mubr.msk.bf16.vlgmr.msra.gmra.mxu1 %vm54_vm0, %v1093_v55 }
 0x61b   :  { %1527 = vmatpush3.bf16.msra.mxu1 %v1580_v54  ;;  %1534 = vmatprep.mubr.msk.bf16.mxu1 %vm1691_vm1, %v1690_v15 }
 0x61c   :  { %1528 = vmatprep.subr.bf16.mxu1 %v1690_v15 }
 0x61f   :  { %1529 = vmatpush3.bf16.msra.mxu1 %v1581_v49 }
 0x620   :  { %1530 = vmatprep.subr.bf16.mxu1 %v1690_v15 }
 0x623   :  { %1531 = vmatpush3.bf16.msra.mxu1 %v1582_v56 }
 0x624   :  { %1532 = vmatprep.subr.bf16.mxu1 %v1690_v15 }
 0x627   :  { %1533 = vmatpush3.bf16.msra.mxu1 %v1583_v57 }
 0x62a   :  { %1535 = vmatmul.mubr.msk.bf16.vlgmr.msra.gmra.mxu1 %vm1261_vm6, %v1224_v32 }
 0x6da   :  { %v1151_v58 = vpop.f32.mrf.mxu1 }
 0x6db   :  { %v1152_v4 = vadd.f32 %v1151_v58, %v1101_v62 }
 0x6dc   :  { %v1516_v59 = vpop.f32.mrf.mxu1 }
 0x6de   :  { %v1154_v60 = vpop.f32.mrf.mxu1 }
 0x6df   :  { %v1155_v8 = vadd.f32 %v1154_v60, %v1101_v62 }
 0x6e0   :  { %v1517_v61 = vpop.f32.mrf.mxu1 }
 0x6ea   :  { %v1299_v63 = vpop.f32.mrf.mxu1 }
 0x6eb   :  { %v1300_v2 = vadd.f32 %v1299_v63, %v1236_v47 }
 0x6ec   :  { %v1536_v3 = vpop.f32.mrf.mxu1 }
 0x6ed   :  { %v1306_v15 = vadd.f32 %v1300_v2, %v1753_v0 }
 0x6ee   :  { %v1302_v5 = vpop.f32.mrf.mxu1 }
 0x6ef   :  { %v1308_v6 = vadd.f32 %v1306_v15, %v1152_v4  ;;  %v1303_v7 = vadd.f32 %v1302_v5, %v1236_v47 }
 0x6f0   :  { %v1537_v53 = vpop.f32.mrf.mxu1 }
 0x6f1   :  { %1310 = vst.msk [vmem:[#allocation7] sm:$0xff] %vm54_vm0, %v1308_v6  ;;  %v1307_v24 = vadd.f32 %v1303_v7, %v1758_v1 }
 0x6f3   :  { %v1309_v9 = vadd.f32 %v1307_v24, %v1155_v8 }
 0x6f5   :  { %1311 = vst.msk [vmem:[#allocation7 + $0x8] sm:$0xff] %vm54_vm0, %v1309_v9 }
 0x6f6   :  { %1671 = shalt.err (!%p1668_p0)
}
 0x6f7   :  { %s1706_s12 = smov 128  }
 0x6f8   :  { %1323 = dma.vmem_to_hbm [thread:$0]  %s1318_s0, 256, %s2041_s6, [#allocation4], %s1706_s12, %s1706_s12, %s1702_s27  }
 0x6f9   :  { %1684 = dma.done.wait [#allocation4], 256  }
 0x6fa   :  { %1685 = vsyncadd [#allocation4], 4294967040 }
 0x6fb   :  { %1327 = vsyncpa [#allocation3], 1 }
 0x6fc   :  { %1328 = vsyncpa [#allocation6], 1 }
 0x6fd   :  { %1329 = vsyncpa [#allocation4], 1 }

</bundles_post_ra>
